<compile_context>
chip_gen: v7x
topology: tpu7x:2x2x1
jax: 0.10.0
libtpu: 0.0.40
codegen_flags: <defaults>
</compile_context>

<pallas_src>
import jax
import jax.numpy as jnp
from jax import lax
from jax.experimental import pallas as pl
from jax.experimental.pallas import tpu as pltpu


# --------------------------------------------------------------------------- #
# Kernel
# --------------------------------------------------------------------------- #
def _make_kernel(batched, pack_out, fast_math):
    """Builds one flash-attention grid-step kernel.

    Block shapes seen by the kernel (batched=True / batched=False):
      q: (tb, tq, D)  / (tq, D)      k: (tb, tk, D) / (tk, D)
      v: (tb, tk, Dv) / (tk, Dv)
      o: packed  -> (tb, tq*Dv/128, 128) / (tq*Dv/128, 128)
         natural -> (tb, tq, Dv)         / (tq, Dv)
    Scratch (f32, persists across the K grid axis):
      m: running max, l: running denominator, acc: running numerator.
    """
    if batched:
        qk_dims = (((2,), (2,)), ((0,), (0,)))   # contract last dims, batch on 0
        pv_dims = (((2,), (1,)), ((0,), (0,)))
    else:
        qk_dims = (((1,), (1,)), ((), ()))
        pv_dims = (((1,), (0,)), ((), ()))

    def kernel(q_ref, k_ref, v_ref, o_ref, m_sc, l_sc, acc_sc):
        ki = pl.program_id(2)

        @pl.when(ki == 0)
        def _init():
            m_sc[...] = jnp.full_like(m_sc, -jnp.inf)
            l_sc[...] = jnp.zeros_like(l_sc)
            acc_sc[...] = jnp.zeros_like(acc_sc)

        q = q_ref[...]
        k = k_ref[...]
        v = v_ref[...]
        if fast_math:
            q = q.astype(jnp.bfloat16)
            k = k.astype(jnp.bfloat16)
            v = v.astype(jnp.bfloat16)

        # score = Q @ K^T as a contraction over the LAST dim of both operands,
        # so no transposed copy of K is ever materialized.  No 1/sqrt(D)
        # scaling (matches the reference module).
        s = lax.dot_general(q, k, dimension_numbers=qk_dims,
                            preferred_element_type=jnp.float32)

        # Online (flash) softmax update.
        m_prev = m_sc[...]
        m_new = jnp.maximum(m_prev, jnp.max(s, axis=-1, keepdims=True))
        alpha = jnp.exp(m_prev - m_new)
        if fast_math:
            # bf16 exp (EUP is bf16-native on v6e/v7x); p feeds the MXU directly.
            p = jnp.exp((s - m_new).astype(jnp.bfloat16))
            row_sum = jnp.sum(p, axis=-1, keepdims=True, dtype=jnp.float32)
        else:
            p = jnp.exp(s - m_new)
            row_sum = jnp.sum(p, axis=-1, keepdims=True)
        # TODO(synk): if profiling shows the XLU row-sum saturating, fold it
        # into the PV matmul by appending a ones column to the V tile.
        l_sc[...] = alpha * l_sc[...] + row_sum
        acc_sc[...] = alpha * acc_sc[...] + lax.dot_general(
            p.astype(v.dtype), v, dimension_numbers=pv_dims,
            preferred_element_type=jnp.float32)
        m_sc[...] = m_new

        @pl.when(ki == pl.num_programs(2) - 1)
        def _finalize():
            out = acc_sc[...] * pl.reciprocal(l_sc[...], approx=fast_math)
            out = out.astype(o_ref.dtype)
            if pack_out:
                out = out.reshape(o_ref.shape)   # lane-dense (.., *, 128) slab
            o_ref[...] = out

    return kernel


# --------------------------------------------------------------------------- #
# Sizing helpers
# --------------------------------------------------------------------------- #
def _vmem_budget_bytes():
    """Usable VMEM budget: physical capacity minus headroom for compiler scratch."""
    cap = 64 * 2**20  # conservative default: v7x per-TensorCore VMEM
    try:
        info = pltpu.get_tpu_info()
        cap = int(getattr(info, "vmem_capacity_bytes", cap) or cap)
    except Exception:
        pass
    # 128 MiB (v5e/v6e) -> ~112 MiB budget; 64 MiB (v7x) -> 48 MiB budget.
    return max(cap - 16 * 2**20, (3 * cap) // 4)


def _pick_tile(n, cap):
    """Largest divisor of n that is a multiple of 128 (lane/MXU friendly) and
    <= cap; else the largest multiple-of-8 divisor <= cap; else n itself
    (the full extent is always a legal block size)."""
    for want128 in (True, False):
        for d in range(min(n, cap), 0, -1):
            if n % d:
                continue
            if want128 and d % 128:
                continue
            if not want128 and d % 8:
                continue
            return d
    # TODO(synk): pad + mask ragged extents instead of falling back to the
    # full axis (a huge prime Lq/Lk would blow the VMEM budget here).
    return n


def _largest_divisor_leq(n, cap):
    for d in range(min(n, cap), 0, -1):
        if n % d == 0:
            return d
    return 1


def _vmem_bytes_estimate(tb, tq, tk, d, dv, itemsize):
    lane = lambda x: max(x, 128)  # last dims are lane-padded to 128
    return (2 * tb * (tq * lane(d) + tk * lane(d) + tk * lane(dv)) * itemsize  # 2x-buffered inputs
            + 2 * tb * tq * lane(dv) * itemsize                                # 2x-buffered output
            + tb * tq * (lane(dv) + 2 * 128) * 4                               # f32 m/l/acc scratch
            + 2 * tb * tq * lane(tk) * 4)                                      # f32 s and p temporaries


# --------------------------------------------------------------------------- #
# Wrapper
# --------------------------------------------------------------------------- #
def dotproduct_attention(query, key, value, *, tq=None, tk=None,
                         use_bf16_matmul=False):
    """softmax(Q @ K^T, dim=-1) @ V with torch.bmm semantics (no scale/dropout).

    use_bf16_matmul=True runs the MXU dots and the softmax exp in bf16 with
    f32 accumulation (~2-3x MXU throughput, half the Q/K/V HBM traffic) at a
    small, flagged numerics cost vs. the f32 reference.
    """
    B, Lq, D = query.shape
    Bk, Lk, Dk = key.shape
    Bv, Lkv, Dv = value.shape
    assert B == Bk == Bv and D == Dk and Lk == Lkv

    out_dtype = query.dtype
    if use_bf16_matmul:
        query = query.astype(jnp.bfloat16)
        key = key.astype(jnp.bfloat16)
        value = value.astype(jnp.bfloat16)
    itemsize = jnp.dtype(query.dtype).itemsize

    budget = _vmem_budget_bytes()

    # --- Tile selection: largest lane/MXU-friendly divisors under the budget.
    tq = tq or _pick_tile(Lq, 512)
    tk = tk or _pick_tile(Lk, 1024)
    assert Lq % tq == 0 and Lk % tk == 0, "tq/tk must divide Lq/Lk"
    while _vmem_bytes_estimate(1, tq, tk, D, Dv, itemsize) > 0.8 * budget:
        if tk >= tq and tk > 128:
            new_tk = _pick_tile(Lk, tk // 2)
            if new_tk >= tk:
                break
            tk = new_tk
        elif tq > 128:
            new_tq = _pick_tile(Lq, tq // 2)
            if new_tq >= tq:
                break
            tq = new_tq
        else:
            break

    # --- Batch folding for tiny per-batch work (amortizes ~0.35us/grid step),
    # bounded by the VMEM budget and by keeping >= 2 parallel grid steps so
    # both v7x TensorCores get work.
    tb = B if (tq * tk <= 128 * 128) else 1
    while tb > 1 and _vmem_bytes_estimate(tb, tq, tk, D, Dv, itemsize) > 0.8 * budget:
        tb = _largest_divisor_leq(B, max(1, tb // 2))
    if B >= 2 and (B // tb) * (Lq // tq) < 2:
        tb = _largest_divisor_leq(B, B // 2)

    grid = (B // tb, Lq // tq, Lk // tk)
    squeeze_b = tb == 1

    vmem_est = _vmem_bytes_estimate(tb, tq, tk, D, Dv, itemsize)
    vmem_limit = int(min(budget, max(32 * 2**20, 2 * vmem_est)))

    n_q_tiles = Lq // tq
    cost = pl.CostEstimate(
        flops=2 * B * Lq * Lk * (D + Dv),
        transcendentals=B * Lq * Lk,
        bytes_accessed=int((B * Lq * D                        # Q read once
                            + B * n_q_tiles * Lk * (D + Dv)   # K/V re-streamed per q tile
                            + B * Lq * Dv) * itemsize))

    # Lane-dense output packing (Dv < 128 would otherwise hit masked vst.msk
    # partial stores): present the output as (B, Lq*Dv/128, 128).
    pack_rows = (tq * Dv) // 128
    pack_eligible = (Dv % 128 != 0
                     and (tq * Dv) % 128 == 0
                     and (pack_rows % 8 == 0 or tq == Lq))

    def build(pack_out):
        def bdim():
            return None if squeeze_b else tb   # None == squeezed batch block dim

        if pack_out:
            out_shape = jax.ShapeDtypeStruct((B, (Lq * Dv) // 128, 128), out_dtype)
            out_spec = pl.BlockSpec((bdim(), pack_rows, 128),
                                    lambda b, qi, ki: (b, qi, 0))
        else:
            out_shape = jax.ShapeDtypeStruct((B, Lq, Dv), out_dtype)
            out_spec = pl.BlockSpec((bdim(), tq, Dv), lambda b, qi, ki: (b, qi, 0))

        sshape = (tq,) if squeeze_b else (tb, tq)
        scratch = [pltpu.VMEM(sshape + (1,), jnp.float32),    # running max
                   pltpu.VMEM(sshape + (1,), jnp.float32),    # running denom
                   pltpu.VMEM(sshape + (Dv,), jnp.float32)]   # running numerator

        kernel = _make_kernel(batched=not squeeze_b, pack_out=pack_out,
                              fast_math=use_bf16_matmul)

        # TODO(synk): if profiling shows exposed K/V DMA (small D, long Lk),
        # add pipeline_mode=pl.Buffered(3) on the K/V BlockSpecs.
        return pl.pallas_call(
            kernel,
            out_shape=out_shape,
            grid_spec=pltpu.PrefetchScalarGridSpec(
                num_scalar_prefetch=0,
                grid=grid,
                in_specs=[
                    pl.BlockSpec((bdim(), tq, D), lambda b, qi, ki: (b, qi, 0)),
                    pl.BlockSpec((bdim(), tk, D), lambda b, qi, ki: (b, ki, 0)),
                    pl.BlockSpec((bdim(), tk, Dv), lambda b, qi, ki: (b, ki, 0)),
                ],
                out_specs=out_spec,
                scratch_shapes=scratch,
            ),
            compiler_params=pltpu.CompilerParams(
                dimension_semantics=("parallel", "parallel", "arbitrary"),
                vmem_limit_bytes=vmem_limit),
            cost_estimate=cost,
        )

    if pack_eligible:
        try:
            out = build(True)(query, key, value)
            return out.reshape(B, Lq, Dv)      # free: identical row-major bytes
        except Exception:
            # The packed store needs an in-kernel (.., tq, Dv) -> (.., tq*Dv/128,
            # 128) shape-cast; if this Mosaic build rejects it, fall back to the
            # natural (correct but masked-store) layout.
            pass
    return build(False)(query, key, value)


# --------------------------------------------------------------------------- #
# Reference & tests
# --------------------------------------------------------------------------- #
def _reference(query, key, value):
    score = jnp.einsum("bqd,bkd->bqk", query, key)
    attn = jax.nn.softmax(score, axis=-1)
    return jnp.einsum("bqk,bkd->bqd", attn, value)


if __name__ == "__main__":
    keys = jax.random.split(jax.random.PRNGKey(0), 12)

    # 1) Tiny shape in the module's bmm layout (B, L, D): squeezed-batch path,
    #    lane-packed output (Dv = 32 < 128).
    B, Lq, Lk, D, Dv = 2, 8, 8, 32, 32
    q = jax.random.normal(keys[0], (B, Lq, D), jnp.float32)
    k = jax.random.normal(keys[1], (B, Lk, D), jnp.float32)
    v = jax.random.normal(keys[2], (B, Lk, Dv), jnp.float32)
    out = jax.block_until_ready(dotproduct_attention(q, k, v))
    ref = _reference(q, k, v)
    assert out.shape == (B, Lq, Dv)
    assert jnp.allclose(out, ref, atol=1e-5, rtol=1e-5), "mismatch (tiny)"

    # 2) Multi-tile shape: explicit tq/tk forces the online-softmax accumulator
    #    across several K grid steps; auto tiles exercise the big-tile path.
    B2, Lq2, Lk2, D2, Dv2 = 2, 256, 384, 64, 64
    q2 = jax.random.normal(keys[3], (B2, Lq2, D2), jnp.float32)
    k2 = jax.random.normal(keys[4], (B2, Lk2, D2), jnp.float32)
    v2 = jax.random.normal(keys[5], (B2, Lk2, Dv2), jnp.float32)
    ref2 = _reference(q2, k2, v2)
    out2 = jax.block_until_ready(dotproduct_attention(q2, k2, v2, tq=128, tk=128))
    assert jnp.allclose(out2, ref2, atol=1e-4, rtol=1e-4), "mismatch (multi-K-tile)"
    out2b = jax.block_until_ready(dotproduct_attention(q2, k2, v2))
    assert jnp.allclose(out2b, ref2, atol=1e-4, rtol=1e-4), "mismatch (auto tiles)"

    # 3) Batch-folded path (tb > 1) for many tiny sequences, with the
    #    >=2-parallel-grid-steps guarantee halving the fold.
    B3, Lq3, Lk3, D3, Dv3 = 8, 8, 16, 32, 32
    q3 = jax.random.normal(keys[6], (B3, Lq3, D3), jnp.float32)
    k3 = jax.random.normal(keys[7], (B3, Lk3, D3), jnp.float32)
    v3 = jax.random.normal(keys[8], (B3, Lk3, Dv3), jnp.float32)
    out3 = jax.block_until_ready(dotproduct_attention(q3, k3, v3))
    ref3 = _reference(q3, k3, v3)
    assert jnp.allclose(out3, ref3, atol=1e-5, rtol=1e-5), "mismatch (batch-folded)"

    # 4) bf16 fast-math knob (MXU dots + exp in bf16, f32 accumulation).
    out4 = jax.block_until_ready(
        dotproduct_attention(q2, k2, v2, use_bf16_matmul=True))
    assert jnp.allclose(out4, ref2, atol=1e-1, rtol=1e-1), "mismatch (bf16 fast path)"

    print("KERNEL_OK")
</pallas_src>

<mosaic_0001>
module attributes {stable_mosaic.version = 11 : i64} {
  func.func @kernel(%arg0: i32, %arg1: i32, %arg2: i32, %arg3: memref<1x8x32xf32, #tpu.memory_space<vmem>>, %arg4: memref<1x8x32xf32, #tpu.memory_space<vmem>>, %arg5: memref<1x8x32xf32, #tpu.memory_space<vmem>>, %arg6: memref<1x2x128xf32, #tpu.memory_space<vmem>>, %arg7: memref<8x1xf32, #tpu.memory_space<vmem>>, %arg8: memref<8x1xf32, #tpu.memory_space<vmem>>, %arg9: memref<8x32xf32, #tpu.memory_space<vmem>>) attributes {dimension_semantics = [#tpu.dimension_semantics<parallel>, #tpu.dimension_semantics<parallel>, #tpu.dimension_semantics<arbitrary>], iteration_bounds = array<i64: 2, 1, 1>, scalar_prefetch = 0 : i64, scratch_operands = 3 : i64, tpu.core_type = #tpu.core_type<tc>, window_params = [{transform_indices = @transform_0, window_bounds = array<i64: 1, 8, 32>}, {transform_indices = @transform_1, window_bounds = array<i64: 1, 8, 32>}, {transform_indices = @transform_2, window_bounds = array<i64: 1, 8, 32>}, {transform_indices = @transform_3, window_bounds = array<i64: 1, 2, 128>}]} {
    %c0_i32 = arith.constant 0 : i32
    %0 = arith.cmpi eq, %arg2, %c0_i32 : i32
    %1 = arith.extui %0 : i1 to i32
    %c0_i32_0 = arith.constant 0 : i32
    %2 = arith.cmpi ne, %1, %c0_i32_0 : i32
    scf.if %2 {
      %cst_26 = arith.constant 0xFF800000 : f32
      %35 = vector.broadcast %cst_26 : f32 to vector<8x1xf32>
      %c0_27 = arith.constant 0 : index
      %c0_28 = arith.constant 0 : index
      %36 = vector.load %arg7[%c0_27, %c0_28] : memref<8x1xf32, #tpu.memory_space<vmem>>, vector<8x1xf32>
      tpu.vector_store %arg7[%c0_27, %c0_28], %35 {strides = array<i32>} : memref<8x1xf32, #tpu.memory_space<vmem>>, vector<8x1xf32>,
      %cst_29 = arith.constant 0.000000e+00 : f32
      %37 = vector.broadcast %cst_29 : f32 to vector<8x1xf32>
      %c0_30 = arith.constant 0 : index
      %c0_31 = arith.constant 0 : index
      %38 = vector.load %arg8[%c0_30, %c0_31] : memref<8x1xf32, #tpu.memory_space<vmem>>, vector<8x1xf32>
      tpu.vector_store %arg8[%c0_30, %c0_31], %37 {strides = array<i32>} : memref<8x1xf32, #tpu.memory_space<vmem>>, vector<8x1xf32>,
      %cst_32 = arith.constant 0.000000e+00 : f32
      %39 = vector.broadcast %cst_32 : f32 to vector<8x32xf32>
      %c0_33 = arith.constant 0 : index
      %c0_34 = arith.constant 0 : index
      %40 = vector.load %arg9[%c0_33, %c0_34] : memref<8x32xf32, #tpu.memory_space<vmem>>, vector<8x32xf32>
      tpu.vector_store %arg9[%c0_33, %c0_34], %39 {strides = array<i32>} : memref<8x32xf32, #tpu.memory_space<vmem>>, vector<8x32xf32>,
    } else {
    }
    %c0 = arith.constant 0 : index
    %c0_1 = arith.constant 0 : index
    %c0_2 = arith.constant 0 : index
    %3 = vector.load %arg3[%c0, %c0_1, %c0_2] : memref<1x8x32xf32, #tpu.memory_space<vmem>>, vector<1x8x32xf32>
    %4 = vector.shape_cast %3 : vector<1x8x32xf32> to vector<8x32xf32>
    %c0_3 = arith.constant 0 : index
    %c0_4 = arith.constant 0 : index
    %c0_5 = arith.constant 0 : index
    %5 = vector.load %arg4[%c0_3, %c0_4, %c0_5] : memref<1x8x32xf32, #tpu.memory_space<vmem>>, vector<1x8x32xf32>
    %6 = vector.shape_cast %5 : vector<1x8x32xf32> to vector<8x32xf32>
    %c0_6 = arith.constant 0 : index
    %c0_7 = arith.constant 0 : index
    %c0_8 = arith.constant 0 : index
    %7 = vector.load %arg5[%c0_6, %c0_7, %c0_8] : memref<1x8x32xf32, #tpu.memory_space<vmem>>, vector<1x8x32xf32>
    %8 = vector.shape_cast %7 : vector<1x8x32xf32> to vector<8x32xf32>
    %cst = arith.constant dense<0.000000e+00> : vector<8x8xf32>
    %9 = tpu.matmul %4, %6, %cst {dimension_numbers = #tpu.dot_dimension_numbers<[1], [1], [0], [0], [0, 0, 1, 0], [], []>} : vector<8x32xf32>, vector<8x32xf32>, vector<8x8xf32> -> vector<8x8xf32>
    %c0_9 = arith.constant 0 : index
    %c0_10 = arith.constant 0 : index
    %10 = vector.load %arg7[%c0_9, %c0_10] : memref<8x1xf32, #tpu.memory_space<vmem>>, vector<8x1xf32>
    %cst_11 = arith.constant dense<0xFF800000> : vector<8xf32>
    %11 = vector.multi_reduction <maximumf>, %9, %cst_11 [1] : vector<8x8xf32> to vector<8xf32>
    %12 = vector.shape_cast %11 : vector<8xf32> to vector<8x1xf32>
    %13 = arith.maximumf %10, %12 : vector<8x1xf32>
    %14 = arith.subf %10, %13 : vector<8x1xf32>
    %15 = math.exp %14 : vector<8x1xf32>
    %16 = vector.broadcast %13 : vector<8x1xf32> to vector<8x8xf32>
    %17 = arith.subf %9, %16 : vector<8x8xf32>
    %18 = math.exp %17 : vector<8x8xf32>
    %cst_12 = arith.constant dense<0.000000e+00> : vector<8xf32>
    %19 = vector.multi_reduction <add>, %18, %cst_12 [1] : vector<8x8xf32> to vector<8xf32>
    %20 = vector.shape_cast %19 : vector<8xf32> to vector<8x1xf32>
    %c0_13 = arith.constant 0 : index
    %c0_14 = arith.constant 0 : index
    %21 = vector.load %arg8[%c0_13, %c0_14] : memref<8x1xf32, #tpu.memory_space<vmem>>, vector<8x1xf32>
    %22 = arith.mulf %15, %21 : vector<8x1xf32>
    %23 = arith.addf %22, %20 : vector<8x1xf32>
    %c0_15 = arith.constant 0 : index
    %c0_16 = arith.constant 0 : index
    %24 = vector.load %arg8[%c0_15, %c0_16] : memref<8x1xf32, #tpu.memory_space<vmem>>, vector<8x1xf32>
    tpu.vector_store %arg8[%c0_15, %c0_16], %23 {strides = array<i32>} : memref<8x1xf32, #tpu.memory_space<vmem>>, vector<8x1xf32>,
    %c0_17 = arith.constant 0 : index
    %c0_18 = arith.constant 0 : index
    %25 = vector.load %arg9[%c0_17, %c0_18] : memref<8x32xf32, #tpu.memory_space<vmem>>, vector<8x32xf32>
    %26 = vector.broadcast %15 : vector<8x1xf32> to vector<8x32xf32>
    %27 = arith.mulf %26, %25 : vector<8x32xf32>
    %cst_19 = arith.constant dense<0.000000e+00> : vector<8x32xf32>
    %28 = tpu.matmul %18, %8, %cst_19 {dimension_numbers = #tpu.dot_dimension_numbers<[1], [0], [0], [1], [0, 0, 1, 1], [], []>} : vector<8x8xf32>, vector<8x32xf32>, vector<8x32xf32> -> vector<8x32xf32>
    %29 = arith.addf %27, %28 : vector<8x32xf32>
    %c0_20 = arith.constant 0 : index
    %c0_21 = arith.constant 0 : index
    %30 = vector.load %arg9[%c0_20, %c0_21] : memref<8x32xf32, #tpu.memory_space<vmem>>, vector<8x32xf32>
    tpu.vector_store %arg9[%c0_20, %c0_21], %29 {strides = array<i32>} : memref<8x32xf32, #tpu.memory_space<vmem>>, vector<8x32xf32>,
    %c0_22 = arith.constant 0 : index
    %c0_23 = arith.constant 0 : index
    %31 = vector.load %arg7[%c0_22, %c0_23] : memref<8x1xf32, #tpu.memory_space<vmem>>, vector<8x1xf32>
    tpu.vector_store %arg7[%c0_22, %c0_23], %13 {strides = array<i32>} : memref<8x1xf32, #tpu.memory_space<vmem>>, vector<8x1xf32>,
    %c0_i32_24 = arith.constant 0 : i32
    %32 = arith.cmpi eq, %arg2, %c0_i32_24 : i32
    %33 = arith.extui %32 : i1 to i32
    %c0_i32_25 = arith.constant 0 : i32
    %34 = arith.cmpi ne, %33, %c0_i32_25 : i32
    scf.if %34 {
      %c0_26 = arith.constant 0 : index
      %c0_27 = arith.constant 0 : index
      %35 = vector.load %arg9[%c0_26, %c0_27] : memref<8x32xf32, #tpu.memory_space<vmem>>, vector<8x32xf32>
      %c0_28 = arith.constant 0 : index
      %c0_29 = arith.constant 0 : index
      %36 = vector.load %arg8[%c0_28, %c0_29] : memref<8x1xf32, #tpu.memory_space<vmem>>, vector<8x1xf32>
      %37 = tpu.reciprocal %36 : vector<8x1xf32> -> vector<8x1xf32>
      %38 = vector.broadcast %37 : vector<8x1xf32> to vector<8x32xf32>
      %39 = arith.mulf %35, %38 : vector<8x32xf32>
      %40 = vector.shape_cast %39 : vector<8x32xf32> to vector<2x128xf32>
      %c0_30 = arith.constant 0 : index
      %c0_31 = arith.constant 0 : index
      %c0_32 = arith.constant 0 : index
      %41 = vector.load %arg6[%c0_30, %c0_31, %c0_32] : memref<1x2x128xf32, #tpu.memory_space<vmem>>, vector<1x2x128xf32>
      %42 = vector.shape_cast %41 : vector<1x2x128xf32> to vector<2x128xf32>
      %43 = vector.shape_cast %40 : vector<2x128xf32> to vector<1x2x128xf32>
      tpu.vector_store %arg6[%c0_30, %c0_31, %c0_32], %43 {strides = array<i32>} : memref<1x2x128xf32, #tpu.memory_space<vmem>>, vector<1x2x128xf32>,
    } else {
    }
    return
  }
  func.func @transform_0(%arg0: i32, %arg1: i32, %arg2: i32) -> (i32, i32, i32) {
    %c0_i32 = arith.constant 0 : i32
    %c0_i32_0 = arith.constant 0 : i32
    return %arg0, %arg1, %c0_i32 : i32, i32, i32
  }
  func.func @transform_1(%arg0: i32, %arg1: i32, %arg2: i32) -> (i32, i32, i32) {
    %c0_i32 = arith.constant 0 : i32
    %c0_i32_0 = arith.constant 0 : i32
    return %arg0, %arg2, %c0_i32 : i32, i32, i32
  }
  func.func @transform_2(%arg0: i32, %arg1: i32, %arg2: i32) -> (i32, i32, i32) {
    %c0_i32 = arith.constant 0 : i32
    %c0_i32_0 = arith.constant 0 : i32
    return %arg0, %arg2, %c0_i32 : i32, i32, i32
  }
  func.func @transform_3(%arg0: i32, %arg1: i32, %arg2: i32) -> (i32, i32, i32) {
    %c0_i32 = arith.constant 0 : i32
    %c0_i32_0 = arith.constant 0 : i32
    return %arg0, %arg1, %c0_i32 : i32, i32, i32
  }
}

module attributes {stable_mosaic.version = 11 : i64} {
  func.func @kernel(%arg0: i32, %arg1: i32, %arg2: i32, %arg3: memref<1x8x32xf32, #tpu.memory_space<vmem>>, %arg4: memref<1x8x32xf32, #tpu.memory_space<vmem>>, %arg5: memref<1x8x32xf32, #tpu.memory_space<vmem>>, %arg6: memref<1x8x32xf32, #tpu.memory_space<vmem>>, %arg7: memref<8x1xf32, #tpu.memory_space<vmem>>, %arg8: memref<8x1xf32, #tpu.memory_space<vmem>>, %arg9: memref<8x32xf32, #tpu.memory_space<vmem>>) attributes {dimension_semantics = [#tpu.dimension_semantics<parallel>, #tpu.dimension_semantics<parallel>, #tpu.dimension_semantics<arbitrary>], iteration_bounds = array<i64: 2, 1, 1>, scalar_prefetch = 0 : i64, scratch_operands = 3 : i64, tpu.core_type = #tpu.core_type<tc>, window_params = [{transform_indices = @transform_0, window_bounds = array<i64: 1, 8, 32>}, {transform_indices = @transform_1, window_bounds = array<i64: 1, 8, 32>}, {transform_indices = @transform_2, window_bounds = array<i64: 1, 8, 32>}, {transform_indices = @transform_3, window_bounds = array<i64: 1, 8, 32>}]} {
    %c0_i32 = arith.constant 0 : i32
    %0 = arith.cmpi eq, %arg2, %c0_i32 : i32
    %1 = arith.extui %0 : i1 to i32
    %c0_i32_0 = arith.constant 0 : i32
    %2 = arith.cmpi ne, %1, %c0_i32_0 : i32
    scf.if %2 {
      %cst_26 = arith.constant 0xFF800000 : f32
      %35 = vector.broadcast %cst_26 : f32 to vector<8x1xf32>
      %c0_27 = arith.constant 0 : index
      %c0_28 = arith.constant 0 : index
      %36 = vector.load %arg7[%c0_27, %c0_28] : memref<8x1xf32, #tpu.memory_space<vmem>>, vector<8x1xf32>
      tpu.vector_store %arg7[%c0_27, %c0_28], %35 {strides = array<i32>} : memref<8x1xf32, #tpu.memory_space<vmem>>, vector<8x1xf32>,
      %cst_29 = arith.constant 0.000000e+00 : f32
      %37 = vector.broadcast %cst_29 : f32 to vector<8x1xf32>
      %c0_30 = arith.constant 0 : index
      %c0_31 = arith.constant 0 : index
      %38 = vector.load %arg8[%c0_30, %c0_31] : memref<8x1xf32, #tpu.memory_space<vmem>>, vector<8x1xf32>
      tpu.vector_store %arg8[%c0_30, %c0_31], %37 {strides = array<i32>} : memref<8x1xf32, #tpu.memory_space<vmem>>, vector<8x1xf32>,
      %cst_32 = arith.constant 0.000000e+00 : f32
      %39 = vector.broadcast %cst_32 : f32 to vector<8x32xf32>
      %c0_33 = arith.constant 0 : index
      %c0_34 = arith.constant 0 : index
      %40 = vector.load %arg9[%c0_33, %c0_34] : memref<8x32xf32, #tpu.memory_space<vmem>>, vector<8x32xf32>
      tpu.vector_store %arg9[%c0_33, %c0_34], %39 {strides = array<i32>} : memref<8x32xf32, #tpu.memory_space<vmem>>, vector<8x32xf32>,
    } else {
    }
    %c0 = arith.constant 0 : index
    %c0_1 = arith.constant 0 : index
    %c0_2 = arith.constant 0 : index
    %3 = vector.load %arg3[%c0, %c0_1, %c0_2] : memref<1x8x32xf32, #tpu.memory_space<vmem>>, vector<1x8x32xf32>
    %4 = vector.shape_cast %3 : vector<1x8x32xf32> to vector<8x32xf32>
    %c0_3 = arith.constant 0 : index
    %c0_4 = arith.constant 0 : index
    %c0_5 = arith.constant 0 : index
    %5 = vector.load %arg4[%c0_3, %c0_4, %c0_5] : memref<1x8x32xf32, #tpu.memory_space<vmem>>, vector<1x8x32xf32>
    %6 = vector.shape_cast %5 : vector<1x8x32xf32> to vector<8x32xf32>
    %c0_6 = arith.constant 0 : index
    %c0_7 = arith.constant 0 : index
    %c0_8 = arith.constant 0 : index
    %7 = vector.load %arg5[%c0_6, %c0_7, %c0_8] : memref<1x8x32xf32, #tpu.memory_space<vmem>>, vector<1x8x32xf32>
    %8 = vector.shape_cast %7 : vector<1x8x32xf32> to vector<8x32xf32>
    %cst = arith.constant dense<0.000000e+00> : vector<8x8xf32>
    %9 = tpu.matmul %4, %6, %cst {dimension_numbers = #tpu.dot_dimension_numbers<[1], [1], [0], [0], [0, 0, 1, 0], [], []>} : vector<8x32xf32>, vector<8x32xf32>, vector<8x8xf32> -> vector<8x8xf32>
    %c0_9 = arith.constant 0 : index
    %c0_10 = arith.constant 0 : index
    %10 = vector.load %arg7[%c0_9, %c0_10] : memref<8x1xf32, #tpu.memory_space<vmem>>, vector<8x1xf32>
    %cst_11 = arith.constant dense<0xFF800000> : vector<8xf32>
    %11 = vector.multi_reduction <maximumf>, %9, %cst_11 [1] : vector<8x8xf32> to vector<8xf32>
    %12 = vector.shape_cast %11 : vector<8xf32> to vector<8x1xf32>
    %13 = arith.maximumf %10, %12 : vector<8x1xf32>
    %14 = arith.subf %10, %13 : vector<8x1xf32>
    %15 = math.exp %14 : vector<8x1xf32>
    %16 = vector.broadcast %13 : vector<8x1xf32> to vector<8x8xf32>
    %17 = arith.subf %9, %16 : vector<8x8xf32>
    %18 = math.exp %17 : vector<8x8xf32>
    %cst_12 = arith.constant dense<0.000000e+00> : vector<8xf32>
    %19 = vector.multi_reduction <add>, %18, %cst_12 [1] : vector<8x8xf32> to vector<8xf32>
    %20 = vector.shape_cast %19 : vector<8xf32> to vector<8x1xf32>
    %c0_13 = arith.constant 0 : index
    %c0_14 = arith.constant 0 : index
    %21 = vector.load %arg8[%c0_13, %c0_14] : memref<8x1xf32, #tpu.memory_space<vmem>>, vector<8x1xf32>
    %22 = arith.mulf %15, %21 : vector<8x1xf32>
    %23 = arith.addf %22, %20 : vector<8x1xf32>
    %c0_15 = arith.constant 0 : index
    %c0_16 = arith.constant 0 : index
    %24 = vector.load %arg8[%c0_15, %c0_16] : memref<8x1xf32, #tpu.memory_space<vmem>>, vector<8x1xf32>
    tpu.vector_store %arg8[%c0_15, %c0_16], %23 {strides = array<i32>} : memref<8x1xf32, #tpu.memory_space<vmem>>, vector<8x1xf32>,
    %c0_17 = arith.constant 0 : index
    %c0_18 = arith.constant 0 : index
    %25 = vector.load %arg9[%c0_17, %c0_18] : memref<8x32xf32, #tpu.memory_space<vmem>>, vector<8x32xf32>
    %26 = vector.broadcast %15 : vector<8x1xf32> to vector<8x32xf32>
    %27 = arith.mulf %26, %25 : vector<8x32xf32>
    %cst_19 = arith.constant dense<0.000000e+00> : vector<8x32xf32>
    %28 = tpu.matmul %18, %8, %cst_19 {dimension_numbers = #tpu.dot_dimension_numbers<[1], [0], [0], [1], [0, 0, 1, 1], [], []>} : vector<8x8xf32>, vector<8x32xf32>, vector<8x32xf32> -> vector<8x32xf32>
    %29 = arith.addf %27, %28 : vector<8x32xf32>
    %c0_20 = arith.constant 0 : index
    %c0_21 = arith.constant 0 : index
    %30 = vector.load %arg9[%c0_20, %c0_21] : memref<8x32xf32, #tpu.memory_space<vmem>>, vector<8x32xf32>
    tpu.vector_store %arg9[%c0_20, %c0_21], %29 {strides = array<i32>} : memref<8x32xf32, #tpu.memory_space<vmem>>, vector<8x32xf32>,
    %c0_22 = arith.constant 0 : index
    %c0_23 = arith.constant 0 : index
    %31 = vector.load %arg7[%c0_22, %c0_23] : memref<8x1xf32, #tpu.memory_space<vmem>>, vector<8x1xf32>
    tpu.vector_store %arg7[%c0_22, %c0_23], %13 {strides = array<i32>} : memref<8x1xf32, #tpu.memory_space<vmem>>, vector<8x1xf32>,
    %c0_i32_24 = arith.constant 0 : i32
    %32 = arith.cmpi eq, %arg2, %c0_i32_24 : i32
    %33 = arith.extui %32 : i1 to i32
    %c0_i32_25 = arith.constant 0 : i32
    %34 = arith.cmpi ne, %33, %c0_i32_25 : i32
    scf.if %34 {
      %c0_26 = arith.constant 0 : index
      %c0_27 = arith.constant 0 : index
      %35 = vector.load %arg9[%c0_26, %c0_27] : memref<8x32xf32, #tpu.memory_space<vmem>>, vector<8x32xf32>
      %c0_28 = arith.constant 0 : index
      %c0_29 = arith.constant 0 : index
      %36 = vector.load %arg8[%c0_28, %c0_29] : memref<8x1xf32, #tpu.memory_space<vmem>>, vector<8x1xf32>
      %37 = tpu.reciprocal %36 : vector<8x1xf32> -> vector<8x1xf32>
      %38 = vector.broadcast %37 : vector<8x1xf32> to vector<8x32xf32>
      %39 = arith.mulf %35, %38 : vector<8x32xf32>
      %c0_30 = arith.constant 0 : index
      %c0_31 = arith.constant 0 : index
      %c0_32 = arith.constant 0 : index
      %40 = vector.load %arg6[%c0_30, %c0_31, %c0_32] : memref<1x8x32xf32, #tpu.memory_space<vmem>>, vector<1x8x32xf32>
      %41 = vector.shape_cast %40 : vector<1x8x32xf32> to vector<8x32xf32>
      %42 = vector.shape_cast %39 : vector<8x32xf32> to vector<1x8x32xf32>
      tpu.vector_store %arg6[%c0_30, %c0_31, %c0_32], %42 {strides = array<i32>} : memref<1x8x32xf32, #tpu.memory_space<vmem>>, vector<1x8x32xf32>,
    } else {
    }
    return
  }
  func.func @transform_0(%arg0: i32, %arg1: i32, %arg2: i32) -> (i32, i32, i32) {
    %c0_i32 = arith.constant 0 : i32
    %c0_i32_0 = arith.constant 0 : i32
    return %arg0, %arg1, %c0_i32 : i32, i32, i32
  }
  func.func @transform_1(%arg0: i32, %arg1: i32, %arg2: i32) -> (i32, i32, i32) {
    %c0_i32 = arith.constant 0 : i32
    %c0_i32_0 = arith.constant 0 : i32
    return %arg0, %arg2, %c0_i32 : i32, i32, i32
  }
  func.func @transform_2(%arg0: i32, %arg1: i32, %arg2: i32) -> (i32, i32, i32) {
    %c0_i32 = arith.constant 0 : i32
    %c0_i32_0 = arith.constant 0 : i32
    return %arg0, %arg2, %c0_i32 : i32, i32, i32
  }
  func.func @transform_3(%arg0: i32, %arg1: i32, %arg2: i32) -> (i32, i32, i32) {
    %c0_i32 = arith.constant 0 : i32
    %c0_i32_0 = arith.constant 0 : i32
    return %arg0, %arg1, %c0_i32 : i32, i32, i32
  }
}

</mosaic_0001>

<bundles_post_ra>
// kernel: tpu_custom_call.1
= control target key start
LH: loop header
LB: loop body
LE: loop exit
PB: predicated region body
PF: predicated region fallthrough
CT: control target
= control target key end

     0   :  { %s1242_s0 = inlined_call_operand.hbm [shape: f32[2,8,32], index: 0, kind: input, shape index: {}]   ;;  %s1243_s1 = inlined_call_operand.hbm [shape: f32[2,8,32], index: 1, kind: input, shape index: {}]   ;;  %s1244_s2 = inlined_call_operand.hbm [shape: f32[2,8,32], index: 2, kind: input, shape index: {}]   ;;  %s1245_s3 = inlined_call_operand.hbm [shape: f32[2,8,32], index: 3, kind: output, shape index: {}]  }
   0x1   :  { %1251 = sst [smem:[#allocation18_spill]] %s1243_s1 }
   0x2   :  { %8 = vsyncpa [#allocation6], 0 }
   0x3   :  { %10 = vsyncpa [#allocation6 + $0x1], 0 }
   0x4   :  { %11 = vsyncpa [#allocation9], 0 }
   0x5   :  { %13 = vsyncpa [#allocation9 + $0x1], 0 }
   0x6   :  { %14 = vsyncpa [#allocation7], 0 }
   0x7   :  { %16 = vsyncpa [#allocation7 + $0x1], 0  ;;  %s966_s12 = smov 0   ;;  %s968_s13 = smov 0  }
   0x8   :  { %s970_s14 = smov 0   ;;  %s972_s15 = smov 0  }
   0x9   :  { %s974_s16 = smov 0   ;;  %s976_s17 = smov 0  }
   0xa LB: > { %1252 = sst [smem:[#allocation15_spill]] %s932_s16  ;;  %s997_s18 = sadd.s32 4294967295, %s936_s17   ;;  %s936_s17 = sphi %s976_s17, %s22_s17   ;;  %s932_s16 = sphi %s974_s16, %s1273_s16   ;;  %s928_s15 = sphi %s972_s15, %s1272_s15   ;;  %s924_s14 = sphi %s970_s14, %s1276_s14   ;;  %s920_s13 = sphi %s968_s13, %s1275_s13   ;;  %s916_s12 = sphi %s966_s12, %s1274_s12  }
   0xb   : > { %s641_s19 = sadd.s32 4294967294, %s936_s17   ;;  %s41_s20 = sadd.s32 1, %s932_s16 }
   0xc   : > { %s50_s21 = sadd.s32 1, %s924_s14  ;;  %p43_p0 = scmp.ge.s32.totalorder %s41_s20, 2 }
   0xd   : > { %p57_p1 = scmp.ne.s32.totalorder %s924_s14, %s920_s13  ;;  %p58_p2 = scmp.eq.s32.totalorder %s936_s17, 0 }
   0xe   : > { %p63_p3 = scmp.ne.s32.totalorder %s920_s13, %s916_s12  ;;  %s1278_s20 = smov (%p43_p0, %s41_s20), 0 }
   0xf   : > { %1253 = sst [smem:[#allocation16_spill]] %s1278_s20  ;;  %p1009_p4 = por %p58_p2, %p57_p1 }
  0x10   : > { %p64_p5 = scmp.eq.s32.totalorder %s997_s18, 0  ;;  %s45_s23 = ssub.s32 %s932_s16, %s1278_s20 }
  0x11   : > { %p145_p6 = scmp.eq.s32.totalorder %s997_s18, 1  ;;  %p48_p7 = scmp.eq.s32.totalorder %s45_s23, 0 }
  0x12   : > { %p1017_p8 = por %p64_p5, %p63_p3  ;;  %p151_p10 = scmp.eq.s32.totalorder %s641_s19, 1 }
  0x13   : > { %p1021_p9 = por %p145_p6, %p57_p1  ;;  %p698_p13 = scmp.lt.s32.totalorder %s936_s17, 2 }
  0x14   : > { %s1255_s24 = scalar_select %p1017_p8, 1, 0 }
  0x15   : > { %s1256_s25 = scalar_select %p1021_p9, 1, 0 }
  0x16   : > { %s1026_s26 = scalar_select %p48_p7, %s924_s14, %s50_s21  }
  0x17   : > { %p1028_p11 = por %p151_p10, %p63_p3  ;;  %s171_s28 = sand.u32 1, %s924_s14  }
  0x18   : > { %1257 = sst [smem:[#allocation17_spill]] %s1026_s26  ;;  %s1037_s29 = sshll.u32 %s171_s28, 3 }
  0x19   : > { %s1258_s27 = scalar_select %p1028_p11, 1, 0 }
  0x1a   : > { %s1040_s30 = sshll.u32 %s932_s16, 7  ;;  %p1044_p0 = pnand %p698_p13, %p1009_p4 }
  0x1b   : > { %s190_s5 = sand.u32 1, %s936_s17   ;;  %s1260_s1 = sld [smem:[#allocation18_spill]] }
  0x1c   : > { %s1259_s4 = scalar_select %p1044_p0, 1, 0 }
  0x1d   : > { %s194_s9 = scalar_lea.vmem [#allocation8], %s1037_s29  ;;  %s1060_s11 = scalar_lea.sflag [#allocation9], %s190_s5 }
  0x1e   : > { %s202_s10 = sshll.u32 %s194_s9, 4  ;;  %p1066_p4 = pneg %p1044_p0  ;;  %s1057_s10 = int_to_ptr.vmem [resolvable:$true] %s202_s10 }
  0x21   : > { %s1053_s8 = scalar_lea.hbm %s1260_s1, %s1040_s30  ;;  %s765_s6 = scalar_lea.hbm %s1260_s1, 256 }
  0x22   : > { %s760_s19 = scalar_lea.hbm %s1053_s8, 128  ;;  %p766_p7 = scmp.lt.u32.totalorder %s1053_s8, %s1260_s1 }
  0x23   : > { %p761_p3 = scmp.ne.s32.totalorder %s1053_s8, %s760_s19  ;;  %p767_p10 = scmp.lt.u32.totalorder %s765_s6, %s760_s19 }
  0x24   : > { %p769_p12 = scmp.lt.u32.totalorder %s760_s19, %s1053_s8 }
  0x25   : > { %p763_p5 = pnand %p1066_p4, %p761_p3  ;;  %p768_p13 = por %p767_p10, %p766_p7 }
  0x27   : > { %p764_p6 = pneg %p763_p5  ;;  %p770_p1 = por %p769_p12, %p768_p13 }
  0x29   : > { %p771_p2 = pnand %p770_p1, %p764_p6 }
  0x2b   : > { %774 = shalt.err (!%p771_p2)
}
  0x2c   : > { %s775_s5 = scalar_lea.vmem %s1057_s10, 128  ;;  %s938_s22 = smov [#allocation8]  }
  0x2d   : > { %p776_p3 = scmp.ne.s32.totalorder %s1057_s10, %s775_s5  ;;  %s780_s23 = sshll.u32 %s938_s22, 4  ;;  %s781_s23 = int_to_ptr.vmem [resolvable:$false] %s780_s23 }
  0x2e   : > { %s782_s7 = scalar_lea.vmem %s781_s23, 256  ;;  %p783_p9 = scmp.lt.s32.totalorder %s1057_s10, %s781_s23 }
  0x2f   : > { %p778_p5 = pnand %p776_p3, %p1066_p4  ;;  %p784_p8 = scmp.lt.s32.totalorder %s782_s7, %s775_s5 }
  0x31   : > { %p779_p11 = pneg %p778_p5  ;;  %p785_p7 = por %p784_p8, %p783_p9 }
  0x33   : > { %p786_p10 = pnand %p785_p7, %p779_p11 }
  0x35   : > { %789 = shalt.err (!%p786_p10)
}
  0x36   : > { %690 = dma.hbm_to_vmem [thread:$0]  (!%p1044_p0), %s1053_s8, 128, %s1057_s10, %s1060_s11  }
  0x37   : > { %p1262_p12 = scmp.lt.s32.totalorder %s936_s17, 3  ;;  %p1263_p1 = scmp.ge.s32.totalorder %s936_s17, 1 }
  0x38   : > { %s1102_s5 = scalar_lea.hbm %s1242_s0, %s1040_s30  ;;  %s175_s22 = scalar_lea.vmem [#allocation5], %s1037_s29 }
  0x39   : > { %p1094_p2 = pnand %p1263_p1, %p1262_p12  ;;  %s183_s23 = sshll.u32 %s175_s22, 4  ;;  %s1105_s23 = int_to_ptr.vmem [resolvable:$true] %s183_s23 }
  0x3a   : > { %s1111_s7 = scalar_lea.hbm %s1244_s2, %s1040_s30  ;;  %s172_s1 = scalar_lea.sflag [#allocation6], %s171_s28 }
  0x3b   : > { %s1264_s19 = scalar_select %p1094_p2, 1, 0 }
  0x3c   : > { %s790_s20 = scalar_lea.hbm %s1102_s5, 128  ;;  %s795_s16 = scalar_lea.hbm %s1242_s0, 256 }
  0x3d   : > { %p791_p8 = scmp.ne.s32.totalorder %s1102_s5, %s790_s20  ;;  %p796_p6 = scmp.lt.u32.totalorder %s1102_s5, %s1242_s0 }
  0x3e   : > { %p797_p13 = scmp.lt.u32.totalorder %s795_s16, %s790_s20  ;;  %p799_p5 = scmp.lt.u32.totalorder %s790_s20, %s1102_s5 }
  0x3f   : > { %p793_p9 = pnand %p791_p8, %p1066_p4 }
  0x40   : > { %p798_p3 = por %p797_p13, %p796_p6 }
  0x41   : > { %p794_p11 = pneg %p793_p9 }
  0x42   : > { %p800_p7 = por %p799_p5, %p798_p3 }
  0x44   : > { %p801_p10 = pnand %p800_p7, %p794_p11 }
  0x46   : > { %804 = shalt.err (!%p801_p10)
}
  0x47   : > { %s805_s28 = scalar_lea.vmem %s1105_s23, 128  ;;  %s939_s30 = smov [#allocation5]  }
  0x48   : > { %p806_p12 = scmp.ne.s32.totalorder %s1105_s23, %s805_s28  ;;  %s810_s8 = sshll.u32 %s939_s30, 4  ;;  %s811_s8 = int_to_ptr.vmem [resolvable:$false] %s810_s8 }
  0x49   : > { %s812_s26 = scalar_lea.vmem %s811_s8, 256  ;;  %p813_p9 = scmp.lt.s32.totalorder %s1105_s23, %s811_s8 }
  0x4a   : > { %p808_p1 = pnand %p806_p12, %p1066_p4  ;;  %p814_p2 = scmp.lt.s32.totalorder %s812_s26, %s805_s28 }
  0x4c   : > { %p809_p8 = pneg %p808_p1  ;;  %p815_p6 = por %p814_p2, %p813_p9 }
  0x4e   : > { %p816_p13 = pnand %p815_p6, %p809_p8 }
  0x50   : > { %819 = shalt.err (!%p816_p13)
}
  0x51   : > { %687 = dma.hbm_to_vmem [thread:$0]  (!%p1044_p0), %s1102_s5, 128, %s1105_s23, %s172_s1  }
  0x52   : > { %s213_s16 = scalar_lea.vmem [#allocation10], %s1037_s29  ;;  %s820_s10 = scalar_lea.hbm %s1111_s7, 128 }
  0x53   : > { %s221_s20 = sshll.u32 %s213_s16, 4  ;;  %p821_p11 = scmp.ne.s32.totalorder %s1111_s7, %s820_s10  ;;  %s222_s20 = int_to_ptr.vmem [resolvable:$true] %s221_s20 }
  0x54   : > { %s825_s22 = scalar_lea.hbm %s1244_s2, 256  ;;  %p826_p5 = scmp.lt.u32.totalorder %s1111_s7, %s1244_s2 }
  0x55   : > { %p823_p2 = pnand %p821_p11, %p1066_p4  ;;  %p827_p7 = scmp.lt.u32.totalorder %s825_s22, %s820_s10 }
  0x56   : > { %p829_p12 = scmp.lt.u32.totalorder %s820_s10, %s1111_s7 }
  0x57   : > { %p824_p3 = pneg %p823_p2  ;;  %p828_p10 = por %p827_p7, %p826_p5 }
  0x59   : > { %p830_p1 = por %p829_p12, %p828_p10 }
  0x5b   : > { %p831_p8 = pnand %p830_p1, %p824_p3 }
  0x5d   : > { %834 = shalt.err (!%p831_p8)
}
  0x5e   : > { %s835_s1 = scalar_lea.vmem %s222_s20, 128  ;;  %s940_s29 = smov [#allocation10]  }
  0x5f   : > { %p836_p9 = scmp.ne.s32.totalorder %s222_s20, %s835_s1  ;;  %s840_s5 = sshll.u32 %s940_s29, 4  ;;  %s841_s5 = int_to_ptr.vmem [resolvable:$false] %s840_s5 }
  0x60   : > { %s842_s23 = scalar_lea.vmem %s841_s5, 256  ;;  %p843_p11 = scmp.lt.s32.totalorder %s222_s20, %s841_s5 }
  0x61   : > { %p838_p6 = pnand %p836_p9, %p1066_p4  ;;  %p844_p2 = scmp.lt.s32.totalorder %s842_s23, %s835_s1 }
  0x63   : > { %p839_p13 = pneg %p838_p6  ;;  %p845_p0 = por %p844_p2, %p843_p11 }
  0x65   : > { %p846_p5 = pnand %p845_p0, %p839_p13 }
  0x67   : > { %849 = shalt.err (!%p846_p5)
}
  0x68   : > { %p1265_p7 = scmp.ne.s32.totalorder %s1259_s4, 0  ;;  %p1266_p3 = scmp.ne.s32.totalorder %s1264_s19, 0 }
  0x69   : > { %s1158_s21 = sand.u32 (!%p1266_p3), 1, %s920_s13   ;;  %p1267_p0 = scmp.ne.s32.totalorder (!%p1266_p3), %s1255_s24, 0 }
  0x6a   : > { %693 = dma.hbm_to_vmem [thread:$0]  (!%p1265_p7), %s1111_s7, 128, %s222_s20, %s1060_s11  }
  0x6b   : > { %230 = sbr.rel (%p1266_p3) target bundleno = 932 (0x3a4), region = 32  ;;  %s1161_s8 = sshll.u32 (!%p1266_p3), %s1158_s21, 3 }
  0x6c   : > { %s233_s26 = scalar_lea.sflag (!%p1266_p3), [#allocation6], %s1158_s21  ;;  %s236_s16 = scalar_lea.vmem (!%p1266_p3), [#allocation5], %s1161_s8 }
  0x72   : > { %903 = dma.done.wait (%p1267_p0), %s233_s26, 128  }
  0x73   : > { %905 = vsyncadd (%p1267_p0), %s233_s26, 4294967168  ;;  %s241_s4 = sand.u32 1, %s997_s18   ;;  %s245_s19 = scalar_lea.vmem [#allocation8], %s1161_s8 }
  0x74   : > { %s242_s11 = scalar_lea.sflag [#allocation9], %s241_s4 }
  0x75   : > { %907 = dma.done.wait (%p1267_p0), %s242_s11, 256  }
  0x76   : > { %909 = vsyncadd (%p1267_p0), %s242_s11, 4294967040  ;;  %vm294_vm0 = vcmask 261120   ;;  %v941_v0 = vmov 0.0   ;;  %vm942_vm1 = vmmov 0   ;;  %v297_v1 = vld [vmem:[%s245_s19] sm:$0xff]  ;;  %v296_v2 = vld [vmem:[%s236_s16] sm:$0xff] }
  0x77   : > { %666 = vmatprep.subr.mxu0 %v941_v0  ;;  %295 = vst.msk [vmem:[#allocation4] sm:$0xff] %vm294_vm0, %v941_v0  ;;  %668 = vmatprep.mubr.msk.f32.mxu0 %vm942_vm1, %v941_v0  ;;  %vm291_vm2 = vcmask 7168   ;;  %v943_v3 = vmov -inf   ;;  %vm377_vm3 = vcmask 64512   ;;  %v944_v7 = vmov 0   ;;  %s254_s18 = scalar_lea.vmem [#allocation10], %s1161_s8 }
  0x78   : > { %671 = vmatprep.subr.mxu1 %v941_v0  ;;  %673 = vmatprep.mubr.msk.f32.mxu1 %vm942_vm1, %v941_v0  ;;  %292 = vst.msk [vmem:[#allocation2] sm:$0xff] %vm291_vm2, %v943_v3  ;;  %293 = vst.msk [vmem:[#allocation3] sm:$0xff] %vm291_vm2, %v941_v0  ;;  %v298_v12 = vld [vmem:[%s254_s18] sm:$0xff]  ;;  %s659_s24 = sshll.u32 %s928_s15, 7  ;;  %s286_s7 = scalar_lea.vmem [#allocation11], %s1161_s8 }
  0x79   : > { %667 = vmatpush3.xpose.msk.msra.mxu0 %vm294_vm0, %v297_v1  ;;  %752 = vset.pattern.permute.xlu0 %v944_v7  ;;  %s512_s20 = sshll.u32 %s286_s7, 4  ;;  %s1192_s9 = scalar_lea.hbm %s1245_s3, %s659_s24  ;;  %s1194_s20 = int_to_ptr.vmem [resolvable:$true] %s512_s20 }
  0x7a   : > { %753 = vset.pattern.permute.xlu1 %v944_v7  ;;  %672 = vmatpush3.msra.mxu1 %v298_v12  ;;  %s498_s22 = scalar_lea.sflag [#allocation7], %s1158_s21  ;;  %s850_s28 = scalar_lea.vmem %s1194_s20, 128 }
  0x7b   : > { %p851_p4 = scmp.ne.s32.totalorder %s1194_s20, %s850_s28  ;;  %p1268_p10 = scmp.ne.s32.totalorder %s1256_s25, 0 }
  0x7c   : > { %669 = vmatmul.mubr.msk.f32.vlgmr.msra.gmra.mrb[0].mxu0 %vm294_vm0, %v296_v2  ;;  %s945_s15 = smov [#allocation11]  }
  0x7d   : > { %p852_p12 = pnand %p851_p4, %p1268_p10  ;;  %s854_s30 = sshll.u32 %s945_s15, 4  ;;  %s855_s30 = int_to_ptr.vmem [resolvable:$false] %s854_s30 }
  0x7e   : > { %v401_v26 = vld [vmem:[#allocation4] sm:$0xff]  ;;  %s856_s1 = scalar_lea.vmem %s855_s30, 256  ;;  %p857_p8 = scmp.lt.s32.totalorder %s1194_s20, %s855_s30 }
  0x7f   : > { %v376_v8 = vld [vmem:[#allocation2] sm:$0xff]  ;;  %v396_v20 = vld [vmem:[#allocation3] sm:$0xff]  ;;  %p853_p1 = pneg %p852_p12  ;;  %p858_p9 = scmp.lt.s32.totalorder %s856_s1, %s850_s28 }
  0x81   : > { %p859_p6 = por %p858_p9, %p857_p8 }
  0x83   : > { %p860_p13 = pnand %p859_p6, %p853_p1 }
 0x14f   : > { %v372_v4 = vpop.f32.mrb[0].mxu0 }
 0x150   : > { %v670_v5 = vpop.f32.mrb[1].mxu0  ;;  %v378_v6 = vsel %vm377_vm3, %v372_v4, -inf }
 0x151   : > { %379 = vmax.xlane.f32.xlu0 %v378_v6 }
 0x1de   : > { %v380_v9 = vpop.xlane.xlu0 %379 }
 0x1df   : > { %v381_v10 = vmax.f32 %v376_v8, %v380_v9 }
 0x1e1   : > { %v382_v11 = vsub.f32 %v376_v8, %v381_v10  ;;  %483 = vst.msk [vmem:[#allocation2] sm:$0xff] %vm291_vm2, %v381_v10  ;;  %387 = vperm.xlu0 %752, %v381_v10  }
 0x1e3   : > { %v383_v18 = vmul.f32 1.442695, %v382_v11 }
 0x260   : > { %v388_v13 = vpop.permute.xlu0 %387 }
 0x261   : > { %v390_v14 = vsub.f32 %v372_v4, %v388_v13 }
 0x263   : > { %v391_v15 = vmul.f32 1.442695, %v390_v14 }
 0x265   : > { %754 = vpow2.f32 %v391_v15 }
 0x266   : > { %756 = vpow2.f32 %v383_v18 }
 0x26f   : > { %v755_v16 = vpop.eup %754 }
 0x270   : > { %674 = vmatmul.mubr.msk.f32.vlgmr.msra.gmra.mrb[0].mxu1 %vm377_vm3, %v755_v16  ;;  %v393_v17 = vsel %vm377_vm3, %v755_v16, 0.0  ;;  %v757_v19 = vpop.eup %756 }
 0x271   : > { %394 = vadd.xlane.f32.xlu1 %v393_v17  ;;  %v397_v21 = vmul.f32 %v757_v19, %v396_v20 }
 0x282   : > { %404 = vperm.xlu1 %753, %v757_v19  }
 0x2fe   : > { %v395_v22 = vpop.xlane.xlu1 %394 }
 0x2ff   : > { %v398_v23 = vadd.f32 %v397_v21, %v395_v22 }
 0x301   : > { %400 = vst.msk [vmem:[#allocation3] sm:$0xff] %vm291_vm2, %v398_v23 }
 0x302   : > { %v405_v27 = vpop.permute.xlu1 %404 }
 0x303   : > { %v407_v28 = vmul.f32 %v405_v27, %v401_v26 }
 0x308   : > { %v488_v24 = vld [vmem:[#allocation3] sm:$0xff] }
 0x309   : > { %758 = vrcp.f32 %v488_v24 }
 0x313   : > { %v759_v25 = vpop.eup %758 }
 0x314   : > { %492 = vperm.xlu1 %753, %v759_v25  }
 0x343   : > { %v477_v29 = vpop.f32.mrb[0].mxu1 }
 0x344   : > { %v481_v30 = vadd.f32 %v477_v29, %v407_v28  ;;  %v675_v31 = vpop.f32.mrb[1].mxu1 }
 0x346   : > { %482 = vst.msk [vmem:[#allocation4] sm:$0xff] %vm294_vm0, %v481_v30 }
 0x34d   : > { %v487_v32 = vld [vmem:[#allocation4] sm:$0xff] }
 0x393   : > { %v493_v33 = vpop.permute.xlu1 %492 }
 0x394   : > { %v495_v34 = vmul.f32 %v493_v33, %v487_v32 }
 0x396   : > { %496 = vst.msk [vmem:[%s286_s7] sm:$0xff] %vm294_vm0, %v495_v34 }
 0x397   : > { %863 = shalt.err (!%p860_p13)
}
 0x398   : > { %s864_s29 = scalar_lea.hbm %s1192_s9, 128  ;;  %s868_s21 = scalar_lea.hbm %s1245_s3, 256 }
 0x399   : > { %p865_p11 = scmp.ne.s32.totalorder %s1192_s9, %s864_s29  ;;  %p869_p7 = scmp.lt.u32.totalorder %s1192_s9, %s1245_s3 }
 0x39a   : > { %p870_p3 = scmp.lt.u32.totalorder %s868_s21, %s864_s29  ;;  %p872_p4 = scmp.lt.u32.totalorder %s864_s29, %s1192_s9 }
 0x39b   : > { %p866_p2 = pnand %p865_p11, %p1268_p10 }
 0x39c   : > { %p871_p0 = por %p870_p3, %p869_p7 }
 0x39d   : > { %p867_p5 = pneg %p866_p2 }
 0x39e   : > { %p873_p12 = por %p872_p4, %p871_p0 }
 0x3a0   : > { %p874_p1 = pnand %p873_p12, %p867_p5 }
 0x3a2   : > { %877 = shalt.err (!%p874_p1)
}
 0x3a3   : > { %682 = dma.vmem_to_hbm [thread:$0]  (%p1268_p10), %s1194_s20, 128, %s1192_s9, %s498_s22  }
 0x3a4 PF: > { %s524_s16 = sand.u32 1, %s916_s12   ;;  %p1269_p8 = scmp.ne.s32.totalorder %s1258_s27, 0 }
 0x3a5   : > { %p1270_p9 = scmp.ge.s32.totalorder %s936_s17, 2  ;;  %s525_s4 = scalar_lea.sflag [#allocation7], %s524_s16 }
 0x3a7   : > { %p695_p6 = pnand %p1270_p9, %p1269_p8 }
 0x3a9   : > { %911 = dma.done.wait (!%p695_p6), %s525_s4, 128  }
 0x3aa   : > { %913 = vsyncadd (!%p695_p6), %s525_s4, 4294967168  ;;  %s22_s17 = sadd.s32 1, %s936_s17   ;;  %s1271_s25 = sld [smem:[#allocation17_spill]] }
 0x3ab   : > { %p19_p13 = scmp.ge.s32.totalorder %s22_s17, 4   ;;  %s1272_s15 = sld [smem:[#allocation15_spill]] }
 0x3ac   : > { %s1273_s16 = sld [smem:[#allocation16_spill]]  ;;  %s1274_s12 = smov %s920_s13 }
 0x3ad   : > { %s1275_s13 = smov %s924_s14  ;;  %21 = sbr.rel (!%p19_p13) target bundleno = 10 (0xa), region = 109 }
 0x3b0   : > { %s1276_s14 = smov %s1271_s25 }
 0x3b4   :  { %530 = vsyncpa [#allocation6], 1 }
 0x3b5   :  { %532 = vsyncpa [#allocation6 + $0x1], 1 }
 0x3b6   :  { %533 = vsyncpa [#allocation9], 1 }
 0x3b7   :  { %535 = vsyncpa [#allocation9 + $0x1], 1 }
 0x3b8   :  { %536 = vsyncpa [#allocation7], 1 }
 0x3b9   :  { %538 = vsyncpa [#allocation7 + $0x1], 1 }

</bundles_post_ra>
